<compile_context>
chip_gen: v7x
topology: tpu7x:2x2x1
jax: 0.10.0
libtpu: 0.0.40
codegen_flags: <defaults>
</compile_context>

<pallas_src>
import jax
import jax.numpy as jnp
from jax.experimental import pallas as pl
from jax.experimental.pallas import tpu as pltpu


def _hbm_copy_kernel(x_hbm, o_hbm, sem):
    # Whole-array HBM -> HBM DMA.  No VMEM staging, no vector load/store.
    cp = pltpu.make_async_copy(x_hbm, o_hbm, sem)
    cp.start()
    cp.wait()


def materialize_feature_copy(x):
    """Explicitly materialized copy of x via a single Pallas HBM->HBM DMA.

    Works for any shape / dtype: both refs stay in their natural HBM layout
    (memory_space=pl.ANY), so there is no padding, reshaping, or slicing.
    """
    return pl.pallas_call(
        _hbm_copy_kernel,
        out_shape=jax.ShapeDtypeStruct(x.shape, x.dtype),
        in_specs=[pl.BlockSpec(memory_space=pl.ANY)],
        out_specs=pl.BlockSpec(memory_space=pl.ANY),
        scratch_shapes=[pltpu.SemaphoreType.DMA(())],
    )(x)


class BackboneBasePallas:
    """JAX/Pallas analogue of the PyTorch BackboneBase."""

    def __init__(self):
        # Base class defines no feature levels.
        self.feature_channels = []

    def get_feature_channels(self):
        return self.feature_channels

    def forward(self, x, materialize_copy=False):
        """Forward pass returning multi-scale features (base-class identity).

        x: jnp.ndarray of shape (B, C, H, W), NCHW.
        Returns: list of feature maps.  For the base class this is [x]; by
        default no copy is made (identity is free).  Set
        `materialize_copy=True` to force a distinct HBM buffer via a single
        Pallas DMA copy.
        """
        if materialize_copy:
            return [materialize_feature_copy(x)]
        return [x]


if __name__ == "__main__":
    key = jax.random.PRNGKey(0)
    # Small shapes consistent with an NCHW backbone input.
    B, C, H, W = 2, 4, 16, 16
    x = jax.random.normal(key, (B, C, H, W), dtype=jnp.float32)

    backbone = BackboneBasePallas()

    # Default (fast) path: pure identity, zero HBM traffic.
    feats = backbone.forward(x)
    feats = [jax.block_until_ready(f) for f in feats]
    assert len(feats) == 1
    assert feats[0].shape == (B, C, H, W)
    assert feats[0].dtype == x.dtype
    assert bool(jnp.array_equal(feats[0], x))

    # Explicitly materialized path: exercises the Pallas HBM->HBM DMA kernel.
    feats_copy = backbone.forward(x, materialize_copy=True)
    feats_copy = [jax.block_until_ready(f) for f in feats_copy]
    assert len(feats_copy) == 1
    assert feats_copy[0].shape == (B, C, H, W)
    assert feats_copy[0].dtype == x.dtype
    assert bool(jnp.array_equal(feats_copy[0], x))

    assert backbone.get_feature_channels() == []

    print("KERNEL_OK")
</pallas_src>

<mosaic_0001>
module attributes {stable_mosaic.version = 11 : i64} {
  func.func @_hbm_copy_kernel(%arg0: memref<2x4x16x16xf32, #tpu.memory_space<any>>, %arg1: memref<2x4x16x16xf32, #tpu.memory_space<any>>, %arg2: memref<!tpu.dma_semaphore, #tpu.memory_space<semaphore_mem>>) attributes {dimension_semantics = [], scalar_prefetch = 0 : i64, scratch_operands = 1 : i64, tpu.core_type = #tpu.core_type<tc>} {
    tpu.enqueue_dma source(%arg0 : memref<2x4x16x16xf32, #tpu.memory_space<any>>) target(%arg1 : memref<2x4x16x16xf32, #tpu.memory_space<any>>) target_semaphore(%arg2 : memref<!tpu.dma_semaphore, #tpu.memory_space<semaphore_mem>>)
    tpu.wait_dma2 semaphore(%arg2 : memref<!tpu.dma_semaphore, #tpu.memory_space<semaphore_mem>>) src(%arg0 : memref<2x4x16x16xf32, #tpu.memory_space<any>>) dst(%arg1 : memref<2x4x16x16xf32, #tpu.memory_space<any>>)
    return
  }
}

</mosaic_0001>

<bundles_post_ra>
// kernel: tpu_custom_call.1
= control target key start
LH: loop header
LB: loop body
LE: loop exit
PB: predicated region body
PF: predicated region fallthrough
CT: control target
= control target key end

     0   :  { %s36_s6 = smov [#allocation2]   ;;  %s37_s7 = smov [#allocation3]   ;;  %s55_s0 = inlined_call_operand.hbm [shape: f32[2,4,16,16], index: 0, kind: input, shape index: {}]   ;;  %s56_s1 = inlined_call_operand.hbm [shape: f32[2,4,16,16], index: 1, kind: output, shape index: {}]  }
   0x1   :  { %s38_s8 = smov 0  }
   0x2   :  { %18 = dma.general %s55_s0, 2048, %s56_s1, %s36_s6, %s37_s7, [#allocation4], %s38_s8, 0  }
   0x3   :  { %34 = dma.done.wait [#allocation2], 2048 }
   0x4   :  { %35 = vsyncadd [#allocation2], 4294965248 }
   0x5   :  { %24 = vsyncmov [#allocation2] }
   0x8   :  { %s25_s13 = vpop.sfrf %24 }
   0x9   :  { %p30_p0 = scmp.ne.s32.totalorder %s25_s13, 0 }
   0xb   :  { %29 = shalt.err (%p30_p0)  }

</bundles_post_ra>
